<compile_context>
chip_gen: v6e
topology: v6e:2x2x1
jax: 0.10.0
libtpu: 0.0.40
codegen_flags: <defaults>
</compile_context>

<pallas_src>
import jax
import jax.numpy as jnp
from jax.experimental import pallas as pl
from jax.experimental.pallas import tpu as pltpu

# ---------------- configuration (small, forward-pass consistent) -------------
G = 8                      # graphs per problem
NODES_PER_GRAPH = 8        # fixed nodes/graph (contiguous, like a batched DGL graph)
N = G * NODES_PER_GRAPH    # total nodes per problem = 64
E = 32                     # graph_embedding_dim
H = 32                     # DDM_config['num_hidden']
T = 16                     # self.ddm.T
ALPHA_L = 2.0              # self.ddm.alpha_l (statically 2.0 -> explicit square)
OUT_LANES = 128            # full-tile output width

assert E == H, "packed wmat layout assumes graph_embedding_dim == num_hidden"

# static weight buffer row offsets (packed ONCE at init, sublane aligned)
R_WPROJ_T = 0              # (H, E)  embedding_projection.weight, transposed
R_W1_T = R_WPROJ_T + H     # (H, H)  denoiser hidden weight, transposed
R_WOUT = R_W1_T + H        # (1, H)  output head
WMAT_ROWS = 72             # padded to a multiple of 8


def _label_diffusion_kernel(nodes_ref, dyn_ref, wmat_ref, wcols_ref, out_ref):
    """Per grid step (one problem):
      nodes_ref: (8, N)      rows [labels, sqrt_ab, sqrt_1m_ab, noise, pad...]
      dyn_ref  : (E+H, N)    rows 0:E = emb^T (per node), E:E+H = (time+bproj)^T
      wmat_ref : (72, H)     static: [w_proj^T ; w1^T ; w_out ; pad]
      wcols_ref: (H, 8)      static columns: 0 = w_in, 1 = b1, (0,2) = b_out
      out_ref  : (8, 128)    row 0 lanes 0:N = pred, row 1 = loss broadcast."""
    f32 = jnp.float32

    # ---- per-node diffusion inputs, lane-dense (1, N) rows ----
    labels_r = nodes_ref[0:1, :]
    sab_r = nodes_ref[1:2, :]
    somab_r = nodes_ref[2:3, :]
    noise_r = nodes_ref[3:4, :]

    # forward diffusion noising: x_t = sqrt(ab)*x0 + sqrt(1-ab)*eps   (1, N)
    noisy_r = sab_r * labels_r + somab_r * noise_r

    # ---- conditioning / weights (static slices) ----
    emb_t = dyn_ref[0:E, :]                       # (E, N) graph emb per node, transposed
    cond0_t = dyn_ref[E:E + H, :]                 # (H, N) time_embed + b_proj, transposed
    wproj_t = wmat_ref[R_WPROJ_T:R_WPROJ_T + H, :]  # (H, E)
    w1_t = wmat_ref[R_W1_T:R_W1_T + H, :]           # (H, H)
    wout = wmat_ref[R_WOUT:R_WOUT + 1, :]           # (1, H)
    win_c = wcols_ref[:, 0:1]                       # (H, 1)
    b1_c = wcols_ref[:, 1:2]                        # (H, 1)
    bout = wcols_ref[0:1, 2:3]                      # (1, 1)

    # ---- conditioning: (embedding_projection(emb) + time_embed)^T, per node ----
    cond_t = jnp.dot(wproj_t, emb_t, preferred_element_type=f32) + cond0_t   # (H, N)

    # ---- DDM denoiser surrogate: x_t injection + conditioning, 2-layer MLP ----
    # TODO(synk): exact DDM.net GNN architecture not provided; MLP surrogate used.
    h0_t = win_c * noisy_r + cond_t                                          # (H, N)
    h1_t = jnp.maximum(
        jnp.dot(w1_t, h0_t, preferred_element_type=f32) + b1_c, 0.0)         # (H, N)

    # predicted_x0 computed ONCE, lane-dense (1, N)
    pred_r = jnp.dot(wout, h1_t, preferred_element_type=f32) + bout          # (1, N)

    # ---- loss_fn(pred, labels, alpha=alpha_l), lane-dense ----
    # TODO(synk): loss_fn definition not provided; SCE/cosine surrogate used
    # (degenerate over a size-1 feature dim -- kept for forward-pass parity).
    eps = 1e-8
    xn = pred_r * jax.lax.rsqrt(pred_r * pred_r + eps)
    yn = labels_r * jax.lax.rsqrt(labels_r * labels_r + eps)
    d = 1.0 - xn * yn
    loss = jnp.sum(d * d) * (1.0 / N)              # alpha_l == 2.0 -> square; scalar

    # ---- single full-tile (8, 128) store ----
    row0 = jnp.concatenate(
        [pred_r, jnp.zeros((1, OUT_LANES - N), f32)], axis=1)                # (1, 128)
    row1 = jnp.broadcast_to(loss, (1, OUT_LANES)).astype(f32)                # (1, 128)
    rest = jnp.zeros((6, OUT_LANES), f32)
    out_ref[...] = jnp.concatenate([row0, row1, rest], axis=0)


@jax.jit
def label_diffusion_forward(graph_embeddings, target_labels,
                            t_nodes, t_per_graph, noise, params):
    """Batched wrapper: B independent problems per pallas_call.
    graph_embeddings (B,G,E), target_labels (B,G), t_nodes (B,N),
    t_per_graph (B,G), noise (B,N,1)."""
    f32 = jnp.float32
    B = graph_embeddings.shape[0]
    t_nodes = jnp.clip(t_nodes, 0, T - 1)
    t_per_graph = jnp.clip(t_per_graph, 0, T - 1)

    # labels_as_nodes / extract(...) as wrapper gathers (nodes contiguous per graph).
    # TODO(synk): variable-size graphs would need segment offsets via scalar prefetch.
    labels_n = jnp.repeat(target_labels.astype(f32), NODES_PER_GRAPH, axis=-1)   # (B, N)
    sab_n = params["sqrt_alphas_bar"][t_nodes]                                   # (B, N)
    somab_n = params["sqrt_one_minus_alphas_bar"][t_nodes]                       # (B, N)
    noise_n = noise.reshape(B, N).astype(f32)                                    # (B, N)
    nodes = jnp.stack([labels_n, sab_n, somab_n, noise_n], axis=1)               # (B, 4, N)
    nodes = jnp.pad(nodes, ((0, 0), (0, 4), (0, 0)))                             # (B, 8, N)

    # dynamic conditioning, already transposed (feature on sublanes, node on lanes)
    emb_t = jnp.repeat(jnp.swapaxes(graph_embeddings.astype(f32), 1, 2),
                       NODES_PER_GRAPH, axis=2)                                  # (B, E, N)
    time_g = params["time_tbl_fold"][t_per_graph]                                # (B, G, H)
    time_t = jnp.repeat(jnp.swapaxes(time_g, 1, 2), NODES_PER_GRAPH, axis=2)     # (B, H, N)
    dyn = jnp.concatenate([emb_t, time_t], axis=1)                               # (B, E+H, N)

    grid_spec = pltpu.PrefetchScalarGridSpec(
        num_scalar_prefetch=0,
        grid=(B,),
        in_specs=[
            pl.BlockSpec((None, 8, N), lambda b: (b, 0, 0)),          # nodes
            pl.BlockSpec((None, E + H, N), lambda b: (b, 0, 0)),      # dyn
            pl.BlockSpec((WMAT_ROWS, H), lambda b: (0, 0)),           # static weights
            pl.BlockSpec((H, 8), lambda b: (0, 0)),                   # static columns
        ],
        out_specs=pl.BlockSpec((None, 8, OUT_LANES), lambda b: (b, 0, 0)),
    )
    out = pl.pallas_call(
        _label_diffusion_kernel,
        out_shape=jax.ShapeDtypeStruct((B, 8, OUT_LANES), f32),
        grid_spec=grid_spec,
        compiler_params=pltpu.CompilerParams(
            dimension_semantics=("parallel",)),
    )(nodes, dyn, params["wmat"], params["wcols"])

    pred = out[:, 0, 0:N][..., None]      # (B, N, 1) predicted_x0_nodes
    loss = out[:, 1, 0]                   # (B,) per-problem loss
    return loss, {"loss": loss}, pred


def _reference_forward(graph_embeddings, target_labels, t_nodes, t_per_graph,
                       noise, params):
    """Pure-JAX reference of the identical (batched) surrogate forward."""
    f32 = jnp.float32
    t_nodes = jnp.clip(t_nodes, 0, T - 1)
    t_per_graph = jnp.clip(t_per_graph, 0, T - 1)
    labels_n = jnp.repeat(target_labels.astype(f32), NODES_PER_GRAPH,
                          axis=-1)[..., None]                                     # (B, N, 1)
    sab = params["sqrt_alphas_bar"][t_nodes][..., None]
    somab = params["sqrt_one_minus_alphas_bar"][t_nodes][..., None]
    noisy = sab * labels_n + somab * noise.astype(f32)                            # (B, N, 1)
    cond_g = (graph_embeddings.astype(f32) @ params["w_proj"] + params["b_proj"]
              + params["time_tbl"][t_per_graph])                                  # (B, G, H)
    cond_n = jnp.repeat(cond_g, NODES_PER_GRAPH, axis=1)                          # (B, N, H)
    h0 = noisy * params["w_in"] + cond_n
    h1 = jnp.maximum(h0 @ params["w1"] + params["b1"], 0.0)
    pred = jnp.sum(h1 * params["w_out"], axis=-1, keepdims=True) + params["b_out"]
    eps = 1e-8
    xn = pred * jax.lax.rsqrt(pred * pred + eps)
    yn = labels_n * jax.lax.rsqrt(labels_n * labels_n + eps)
    d = 1.0 - xn * yn
    return jnp.mean(d * d, axis=(1, 2)), pred


def init_params(key):
    f32 = jnp.float32
    ks = jax.random.split(key, 8)
    betas = jnp.linspace(1e-4, 2e-2, T, dtype=f32)
    alphas_bar = jnp.cumprod(1.0 - betas)
    time_tbl = 0.02 * jax.random.normal(ks[0], (T, H), f32)   # TODO(synk): DDM.time_embedding surrogate
    w_proj = 0.05 * jax.random.normal(ks[1], (E, H), f32)
    b_proj = 0.01 * jax.random.normal(ks[2], (1, H), f32)
    w_in = 0.05 * jax.random.normal(ks[3], (1, H), f32)
    w1 = 0.05 * jax.random.normal(ks[4], (H, H), f32)
    b1 = 0.01 * jax.random.normal(ks[5], (1, H), f32)
    w_out = 0.05 * jax.random.normal(ks[6], (1, H), f32)
    b_out = 0.01 * jax.random.normal(ks[7], (1, 1), f32)

    params = {
        "sqrt_alphas_bar": jnp.sqrt(alphas_bar),                  # (T,)
        "sqrt_one_minus_alphas_bar": jnp.sqrt(1.0 - alphas_bar),  # (T,)
        "time_tbl": time_tbl, "w_proj": w_proj, "b_proj": b_proj,
        "w_in": w_in, "w1": w1, "b1": b1, "w_out": w_out, "b_out": b_out,
    }
    # -------- init-time packing (hoisted out of the per-call path) --------
    params["time_tbl_fold"] = time_tbl + b_proj                           # fold b_proj
    params["wmat"] = jnp.concatenate(
        [w_proj.T, w1.T, w_out,
         jnp.zeros((WMAT_ROWS - (2 * H + 1), H), f32)], axis=0)           # (72, H)
    wcols = jnp.zeros((H, 8), f32)
    wcols = wcols.at[:, 0].set(w_in[0]).at[:, 1].set(b1[0]).at[0, 2].set(b_out[0, 0])
    params["wcols"] = wcols                                               # (H, 8)
    return params


if __name__ == "__main__":
    B = 4   # independent problems batched into one pallas_call
    key = jax.random.PRNGKey(0)
    k_emb, k_lab, k_tn, k_tg, k_noise, k_params = jax.random.split(key, 6)

    graph_embeddings = jax.random.normal(k_emb, (B, G, E), jnp.float32)
    target_labels = jax.random.normal(k_lab, (B, G), jnp.float32)
    t_nodes = jax.random.randint(k_tn, (B, N), 0, T)
    t_per_graph = jax.random.randint(k_tg, (B, G), 0, T)
    noise = jax.random.normal(k_noise, (B, N, 1), jnp.float32)
    params = init_params(k_params)

    loss, loss_item, pred = label_diffusion_forward(
        graph_embeddings, target_labels, t_nodes, t_per_graph, noise, params)
    jax.block_until_ready((loss, pred))

    ref_loss, ref_pred = _reference_forward(
        graph_embeddings, target_labels, t_nodes, t_per_graph, noise, params)

    assert pred.shape == (B, N, 1)
    assert loss.shape == (B,)
    assert bool(jnp.all(jnp.isfinite(loss)))
    assert jnp.allclose(pred, ref_pred, rtol=1e-3, atol=1e-3)
    assert jnp.allclose(loss, ref_loss, rtol=1e-2, atol=1e-2)
    print("KERNEL_OK")
</pallas_src>

<mosaic_0001>
module attributes {stable_mosaic.version = 11 : i64} {
  func.func @_label_diffusion_kernel(%arg0: i32, %arg1: memref<1x8x64xf32, #tpu.memory_space<vmem>>, %arg2: memref<1x64x64xf32, #tpu.memory_space<vmem>>, %arg3: memref<72x32xf32, #tpu.memory_space<vmem>>, %arg4: memref<32x8xf32, #tpu.memory_space<vmem>>, %arg5: memref<1x8x128xf32, #tpu.memory_space<vmem>>) attributes {dimension_semantics = [#tpu.dimension_semantics<parallel>], iteration_bounds = array<i64: 4>, scalar_prefetch = 0 : i64, scratch_operands = 0 : i64, tpu.core_type = #tpu.core_type<tc>, window_params = [{transform_indices = @transform_0, window_bounds = array<i64: 1, 8, 64>}, {transform_indices = @transform_1, window_bounds = array<i64: 1, 64, 64>}, {pipeline_mode = #tpu.pipeline_mode<synchronous>, transform_indices = @transform_2, window_bounds = array<i64: 72, 32>}, {pipeline_mode = #tpu.pipeline_mode<synchronous>, transform_indices = @transform_3, window_bounds = array<i64: 32, 8>}, {transform_indices = @transform_4, window_bounds = array<i64: 1, 8, 128>}]} {
    %c0 = arith.constant 0 : index
    %c0_0 = arith.constant 0 : index
    %c0_1 = arith.constant 0 : index
    %0 = vector.load %arg1[%c0, %c0_0, %c0_1] : memref<1x8x64xf32, #tpu.memory_space<vmem>>, vector<1x1x64xf32>
    %1 = vector.shape_cast %0 : vector<1x1x64xf32> to vector<1x64xf32>
    %c0_2 = arith.constant 0 : index
    %c1 = arith.constant 1 : index
    %c0_3 = arith.constant 0 : index
    %2 = vector.load %arg1[%c0_2, %c1, %c0_3] : memref<1x8x64xf32, #tpu.memory_space<vmem>>, vector<1x1x64xf32>
    %3 = vector.shape_cast %2 : vector<1x1x64xf32> to vector<1x64xf32>
    %c0_4 = arith.constant 0 : index
    %c2 = arith.constant 2 : index
    %c0_5 = arith.constant 0 : index
    %4 = vector.load %arg1[%c0_4, %c2, %c0_5] : memref<1x8x64xf32, #tpu.memory_space<vmem>>, vector<1x1x64xf32>
    %5 = vector.shape_cast %4 : vector<1x1x64xf32> to vector<1x64xf32>
    %c0_6 = arith.constant 0 : index
    %c3 = arith.constant 3 : index
    %c0_7 = arith.constant 0 : index
    %6 = vector.load %arg1[%c0_6, %c3, %c0_7] : memref<1x8x64xf32, #tpu.memory_space<vmem>>, vector<1x1x64xf32>
    %7 = vector.shape_cast %6 : vector<1x1x64xf32> to vector<1x64xf32>
    %8 = arith.mulf %3, %1 : vector<1x64xf32>
    %9 = arith.mulf %5, %7 : vector<1x64xf32>
    %10 = arith.addf %8, %9 : vector<1x64xf32>
    %c0_8 = arith.constant 0 : index
    %c0_9 = arith.constant 0 : index
    %c0_10 = arith.constant 0 : index
    %11 = vector.load %arg2[%c0_8, %c0_9, %c0_10] : memref<1x64x64xf32, #tpu.memory_space<vmem>>, vector<1x32x64xf32>
    %12 = vector.shape_cast %11 : vector<1x32x64xf32> to vector<32x64xf32>
    %c0_11 = arith.constant 0 : index
    %c32 = arith.constant 32 : index
    %c0_12 = arith.constant 0 : index
    %13 = vector.load %arg2[%c0_11, %c32, %c0_12] : memref<1x64x64xf32, #tpu.memory_space<vmem>>, vector<1x32x64xf32>
    %14 = vector.shape_cast %13 : vector<1x32x64xf32> to vector<32x64xf32>
    %c0_13 = arith.constant 0 : index
    %c0_14 = arith.constant 0 : index
    %15 = vector.load %arg3[%c0_13, %c0_14] : memref<72x32xf32, #tpu.memory_space<vmem>>, vector<32x32xf32>
    %c32_15 = arith.constant 32 : index
    %c0_16 = arith.constant 0 : index
    %16 = vector.load %arg3[%c32_15, %c0_16] : memref<72x32xf32, #tpu.memory_space<vmem>>, vector<32x32xf32>
    %c64 = arith.constant 64 : index
    %c0_17 = arith.constant 0 : index
    %17 = vector.load %arg3[%c64, %c0_17] : memref<72x32xf32, #tpu.memory_space<vmem>>, vector<1x32xf32>
    %c0_18 = arith.constant 0 : index
    %c0_19 = arith.constant 0 : index
    %18 = vector.load %arg4[%c0_18, %c0_19] : memref<32x8xf32, #tpu.memory_space<vmem>>, vector<32x1xf32>
    %c0_20 = arith.constant 0 : index
    %c1_21 = arith.constant 1 : index
    %19 = vector.load %arg4[%c0_20, %c1_21] : memref<32x8xf32, #tpu.memory_space<vmem>>, vector<32x1xf32>
    %c0_22 = arith.constant 0 : index
    %c2_23 = arith.constant 2 : index
    %20 = vector.load %arg4[%c0_22, %c2_23] : memref<32x8xf32, #tpu.memory_space<vmem>>, vector<1x1xf32>
    %cst = arith.constant dense<0.000000e+00> : vector<32x64xf32>
    %21 = tpu.matmul %15, %12, %cst {dimension_numbers = #tpu.dot_dimension_numbers<[1], [0], [0], [1], [0, 0, 1, 1], [], []>} : vector<32x32xf32>, vector<32x64xf32>, vector<32x64xf32> -> vector<32x64xf32>
    %22 = arith.addf %21, %14 : vector<32x64xf32>
    %23 = vector.broadcast %18 : vector<32x1xf32> to vector<32x64xf32>
    %24 = vector.broadcast %10 : vector<1x64xf32> to vector<32x64xf32>
    %25 = arith.mulf %23, %24 : vector<32x64xf32>
    %26 = arith.addf %25, %22 : vector<32x64xf32>
    %cst_24 = arith.constant dense<0.000000e+00> : vector<32x64xf32>
    %27 = tpu.matmul %16, %26, %cst_24 {dimension_numbers = #tpu.dot_dimension_numbers<[1], [0], [0], [1], [0, 0, 1, 1], [], []>} : vector<32x32xf32>, vector<32x64xf32>, vector<32x64xf32> -> vector<32x64xf32>
    %28 = vector.broadcast %19 : vector<32x1xf32> to vector<32x64xf32>
    %29 = arith.addf %27, %28 : vector<32x64xf32>
    %cst_25 = arith.constant 0.000000e+00 : f32
    %30 = vector.broadcast %cst_25 : f32 to vector<32x64xf32>
    %31 = arith.maximumf %29, %30 : vector<32x64xf32>
    %cst_26 = arith.constant dense<0.000000e+00> : vector<1x64xf32>
    %32 = tpu.matmul %17, %31, %cst_26 {dimension_numbers = #tpu.dot_dimension_numbers<[1], [0], [0], [1], [0, 0, 1, 1], [], []>} : vector<1x32xf32>, vector<32x64xf32>, vector<1x64xf32> -> vector<1x64xf32>
    %33 = vector.broadcast %20 : vector<1x1xf32> to vector<1x64xf32>
    %34 = arith.addf %32, %33 : vector<1x64xf32>
    %35 = arith.mulf %34, %34 : vector<1x64xf32>
    %cst_27 = arith.constant 9.99999993E-9 : f32
    %36 = vector.broadcast %cst_27 : f32 to vector<1x64xf32>
    %37 = arith.addf %35, %36 : vector<1x64xf32>
    %38 = math.rsqrt %37 : vector<1x64xf32>
    %39 = arith.mulf %34, %38 : vector<1x64xf32>
    %40 = arith.mulf %1, %1 : vector<1x64xf32>
    %cst_28 = arith.constant 9.99999993E-9 : f32
    %41 = vector.broadcast %cst_28 : f32 to vector<1x64xf32>
    %42 = arith.addf %40, %41 : vector<1x64xf32>
    %43 = math.rsqrt %42 : vector<1x64xf32>
    %44 = arith.mulf %1, %43 : vector<1x64xf32>
    %45 = arith.mulf %39, %44 : vector<1x64xf32>
    %cst_29 = arith.constant 1.000000e+00 : f32
    %46 = vector.broadcast %cst_29 : f32 to vector<1x64xf32>
    %47 = arith.subf %46, %45 : vector<1x64xf32>
    %48 = arith.mulf %47, %47 : vector<1x64xf32>
    %49 = vector.shape_cast %48 : vector<1x64xf32> to vector<1x1x64xf32>
    %cst_30 = arith.constant dense<0.000000e+00> : vector<1xf32>
    %50 = vector.multi_reduction <add>, %49, %cst_30 [1, 2] : vector<1x1x64xf32> to vector<1xf32>
    %51 = vector.shape_cast %50 : vector<1xf32> to vector<1x1x1xf32>
    %52 = vector.extract %51[0, 0, 0] : f32 from vector<1x1x1xf32>
    %cst_31 = arith.constant 1.562500e-02 : f32
    %53 = arith.mulf %52, %cst_31 : f32
    %cst_32 = arith.constant 0.000000e+00 : f32
    %54 = vector.broadcast %cst_32 : f32 to vector<1x64xf32>
    %55 = tpu.concatenate %34, %54 in 1 : vector<1x64xf32>, vector<1x64xf32> -> vector<1x128xf32>
    %56 = vector.broadcast %53 : f32 to vector<1x128xf32>
    %cst_33 = arith.constant 0.000000e+00 : f32
    %57 = vector.broadcast %cst_33 : f32 to vector<6x128xf32>
    %58 = tpu.concatenate %55, %56, %57 in 0 : vector<1x128xf32>, vector<1x128xf32>, vector<6x128xf32> -> vector<8x128xf32>
    %c0_34 = arith.constant 0 : index
    %c0_35 = arith.constant 0 : index
    %c0_36 = arith.constant 0 : index
    %59 = vector.load %arg5[%c0_34, %c0_35, %c0_36] : memref<1x8x128xf32, #tpu.memory_space<vmem>>, vector<1x8x128xf32>
    %60 = vector.shape_cast %59 : vector<1x8x128xf32> to vector<8x128xf32>
    %61 = vector.shape_cast %58 : vector<8x128xf32> to vector<1x8x128xf32>
    tpu.vector_store %arg5[%c0_34, %c0_35, %c0_36], %61 {strides = array<i32>} : memref<1x8x128xf32, #tpu.memory_space<vmem>>, vector<1x8x128xf32>,
    return
  }
  func.func @transform_0(%arg0: i32) -> (i32, i32, i32) {
    %c0_i32 = arith.constant 0 : i32
    %c0_i32_0 = arith.constant 0 : i32
    %c0_i32_1 = arith.constant 0 : i32
    return %arg0, %c0_i32, %c0_i32_0 : i32, i32, i32
  }
  func.func @transform_1(%arg0: i32) -> (i32, i32, i32) {
    %c0_i32 = arith.constant 0 : i32
    %c0_i32_0 = arith.constant 0 : i32
    %c0_i32_1 = arith.constant 0 : i32
    return %arg0, %c0_i32, %c0_i32_0 : i32, i32, i32
  }
  func.func @transform_2(%arg0: i32) -> (i32, i32) {
    %c0_i32 = arith.constant 0 : i32
    %c0_i32_0 = arith.constant 0 : i32
    %c0_i32_1 = arith.constant 0 : i32
    return %c0_i32, %c0_i32_0 : i32, i32
  }
  func.func @transform_3(%arg0: i32) -> (i32, i32) {
    %c0_i32 = arith.constant 0 : i32
    %c0_i32_0 = arith.constant 0 : i32
    %c0_i32_1 = arith.constant 0 : i32
    return %c0_i32, %c0_i32_0 : i32, i32
  }
  func.func @transform_4(%arg0: i32) -> (i32, i32, i32) {
    %c0_i32 = arith.constant 0 : i32
    %c0_i32_0 = arith.constant 0 : i32
    %c0_i32_1 = arith.constant 0 : i32
    return %arg0, %c0_i32, %c0_i32_0 : i32, i32, i32
  }
}

</mosaic_0001>

<bundles_post_ra>
// kernel: label_diffusion_forward.1
= control target key start
LH: loop header
LB: loop body
LE: loop exit
PB: predicated region body
PF: predicated region fallthrough
CT: control target
= control target key end

     0   :  { %s807_s15 = smov 0   ;;  %s902_s0 = inlined_call_operand.vmem [shape: f32[4,8,64], index: 0, kind: input, shape index: {}]   ;;  %s903_s1 = inlined_call_operand.vmem [shape: f32[4,64,64], index: 1, kind: input, shape index: {}]   ;;  %s904_s2 = inlined_call_operand.vmem [shape: f32[72,32], index: 2, kind: input, shape index: {}]   ;;  %s905_s3 = inlined_call_operand.vmem [shape: f32[32,8], index: 3, kind: input, shape index: {}]   ;;  %s906_s4 = inlined_call_operand.vmem [shape: f32[4,8,128], index: 4, kind: output, shape index: {}]  }
   0x1 LB: > { %s663_s16 = sadd.s32 4294967295, %s775_s15   ;;  %p667_p0 = scmp.ge.s32.totalorder %s775_s15, 1  ;;  %s775_s15 = sphi %s807_s15, %s14_s15  }
   0x2   : > { %p171_p1 = scmp.lt.s32.totalorder %s775_s15, 5 }
   0x4   : > { %p172_p2 = pnand %p667_p0, %p171_p1 }
   0x5   : > { %p200_p3 = scmp.lt.s32.totalorder (!%p172_p2), %s663_s16, 3 }
   0x6   : > { %175 = sbr.rel (%p172_p2) target bundleno = 868 (0x364), region = 36 }
   0xb   : > { %v228_v0 = vld [vmem:[%s904_s2] sm:$0xff]  ;;  %vm242_vm0 = vcmask 261120   ;;  %v777_v1 = vmov 0   ;;  %v240_v2 = vld [vmem:[%s905_s3 + $0x18] sm:$0xff]  ;;  %v238_v3 = vld [vmem:[%s905_s3 + $0x8] sm:$0xff]  ;;  %s908_s16 = smov (!%p200_p3, %s663_s16), 3  ;;  %v360_v15 = vlaneseq }
   0xc   : > { %713 = vmatprep.mubr.msk.f32.mxu0 %vm242_vm0, %v228_v0  ;;  %760 = vset.pattern.permute.xlu1 %v777_v1  ;;  %v237_v4 = vld [vmem:[%s905_s3] sm:$0xff]  ;;  %s683_s25 = sshll.u32 %s908_s16, 6  ;;  %v239_v5 = vld [vmem:[%s905_s3 + $0x10] sm:$0xff]  ;;  %v229_v10 = vld [vmem:[%s904_s2 + $0x8] sm:$0xff]  ;;  %v778_v14 = vmov 1   ;;  %s668_s13 = sshll.u32 %s908_s16, 3 }
   0xd   : > { %759 = vset.pattern.permute.xlu0 %v777_v1  ;;  %347 = vperm.xlu1 %760, %v238_v3   ;;  %s837_s30 = scalar_lea.vmem %s903_s1, %s683_s25  ;;  %v230_v11 = vld [vmem:[%s904_s2 + $0x10] sm:$0xff]  ;;  %v231_v12 = vld [vmem:[%s904_s2 + $0x18] sm:$0xff]  ;;  %v232_v13 = vld [vmem:[%s904_s2 + $0x20] sm:$0xff]  ;;  %s203_s18 = scalar_lea.vmem %s902_s0, %s668_s13  ;;  %v361_v20 = vshrl.u32 %v360_v15, 7  ;;  %v779_v53 = vmov 0.0   ;;  %vm780_vm1 = vmmov 0  }
   0xe   : > { %357 = vperm.xlu0 %759, %v240_v2   ;;  %v223_v6 = vld [vmem:[%s837_s30 + $0x18] sm:$0xff]  ;;  %v222_v7 = vld [vmem:[%s837_s30 + $0x10] sm:$0xff]  ;;  %v221_v8 = vld [vmem:[%s837_s30 + $0x8] sm:$0xff]  ;;  %727 = vmatprep.mubr.msk.f32.mxu1 %vm242_vm0, %v232_v13  ;;  %v781_v55 = vmov 2   ;;  %vm578_vm2 = vcmask 516096   ;;  %vm590_vm3 = vcmask 523264   ;;  %s212_s7 = scalar_lea.vmem %s906_s4, %s668_s13 }
   0xf   : > { %705 = vmatprep.subr.mxu0 %v223_v6  ;;  %v220_v9 = vld [vmem:[%s837_s30] sm:$0xff]  ;;  %v362_v23 = vsub.s32 0, %v361_v20  ;;  %v227_v30 = vld [vmem:[%s837_s30 + $0x38] sm:$0xff]  ;;  %v225_v31 = vld [vmem:[%s837_s30 + $0x28] sm:$0xff]  ;;  %vm593_vm4 = vcmask 1040384   ;;  %vm595_vm5 = vcmask 1041408  }
  0x10   : > { %706 = vmatpush3.msra.mxu0 %v223_v6  ;;  %v865_v16 = vld [vmem:[%s203_s18] sm:$0x1]  ;;  %v214_v17 = vld [vmem:[%s203_s18 + $0x1] sm:$0x1]  ;;  %v215_v18 = vld [vmem:[%s203_s18 + $0x2] sm:$0x1] }
  0x11   : > { %342 = vperm.xlu1 %760, %v237_v4   ;;  %707 = vmatprep.subr.mxu0 %v222_v7  ;;  %v216_v19 = vld [vmem:[%s203_s18 + $0x3] sm:$0x1]  ;;  %v217_v21 = vmul.f32 %v214_v17, %v865_v16  ;;  %v226_v34 = vld [vmem:[%s837_s30 + $0x30] sm:$0xff]  ;;  %v233_v50 = vld [vmem:[%s904_s2 + $0x28] sm:$0xff] }
  0x12   : > { %352 = vperm.xlu0 %759, %v239_v5   ;;  %708 = vmatpush3.msra.mxu0 %v222_v7  ;;  %v218_v22 = vmul.f32 %v216_v19, %v215_v18  ;;  %v224_v39 = vld [vmem:[%s837_s30 + $0x20] sm:$0xff]  ;;  %v234_v51 = vld [vmem:[%s904_s2 + $0x30] sm:$0xff]  ;;  %v235_v52 = vld [vmem:[%s904_s2 + $0x38] sm:$0xff] }
  0x13   : > { %709 = vmatprep.subr.mxu0 %v221_v8  ;;  %v241_v54 = vld [vmem:[%s905_s3] sm:$0x1] }
  0x14   : > { %710 = vmatpush3.msra.mxu0 %v221_v8  ;;  %v219_v25 = vadd.f32 %v218_v22, %v217_v21  ;;  %v236_v8 = vld [vmem:[%s904_s2 + $0x40] sm:$0x1] }
  0x15   : > { %711 = vmatprep.subr.mxu0 %v220_v9  ;;  %762 = vset.pattern.permute.xlu1 %v778_v14 }
  0x16   : > { %712 = vmatpush3.msra.mxu0 %v220_v9  ;;  %761 = vset.pattern.permute.xlu0 %v778_v14  ;;  %v363_v28 = vrot.slane %v219_v25, %v362_v23  ;;  %v571_v9 = vmul.f32 %v865_v16, %v865_v16 }
  0x17   : > { %714 = vmatmul.mubr.msk.f32.vlgmr.msra.gmra.mxu0 %vm242_vm0, %v229_v10  ;;  %381 = vperm.xlu1 %762, %v239_v5  }
  0x18   : > { %716 = vmatprep.mubr.msk.f32.mxu0 %vm242_vm0, %v230_v11  ;;  %385 = vperm.xlu0 %761, %v240_v2   ;;  %v572_v11 = vadd.f32 1e-08, %v571_v9 }
  0x19   : > { %733 = vmatprep.subr.mxu0 %v779_v53 }
  0x1a   : > { %765 = vrsqrt.f32 %v572_v11 }
  0x1b   : > { %717 = vmatmul.mubr.msk.f32.gmra.mxu0 %vm242_vm0, %v231_v12  ;;  %377 = vperm.xlu1 %762, %v238_v3  }
  0x1c   : > { %373 = vperm.xlu0 %761, %v237_v4   ;;  %741 = vmatprep.mubr.msk.f32.mxu0 %vm780_vm1, %v779_v53 }
  0x1f   : > { %763 = vset.pattern.permute.xlu1 %v781_v55 }
  0x20   : > { %764 = vset.pattern.permute.xlu0 %v781_v55  ;;  %491 = vperm.xlu1 %763, %v241_v54  }
  0x27   : > { %v766_v18 = vpop.eup %765 }
  0x28   : > { %v574_v19 = vmul.f32 %v766_v18, %v865_v16 }
  0x88   : > { %v348_v26 = vpop.permute.xlu1 %347 }
  0x89   : > { %v358_v24 = vpop.permute.xlu0 %357  ;;  %v365_v37 = vmul.f32 %v363_v28, %v348_v26 }
  0x8a   : > { %v367_v35 = vmul.f32 %v363_v28, %v358_v24 }
  0x8c   : > { %v343_v38 = vpop.permute.xlu1 %342 }
  0x8d   : > { %v353_v32 = vpop.permute.xlu0 %352  ;;  %v364_v45 = vmul.f32 %v363_v28, %v343_v38 }
  0x8e   : > { %v366_v42 = vmul.f32 %v363_v28, %v353_v32 }
  0x92   : > { %v382_v56 = vpop.permute.xlu1 %381 }
  0x93   : > { %v386_v57 = vpop.permute.xlu0 %385 }
  0x96   : > { %v378_v60 = vpop.permute.xlu1 %377 }
  0x97   : > { %v374_v63 = vpop.permute.xlu0 %373 }
  0x9b   : > { %v492_v10 = vpop.permute.xlu1 %491 }
  0xd7   : > { %v715_v27 = vpop.f32.mrf.mxu0 }
  0xd8   : > { %v327_v41 = vadd.f32 %v715_v27, %v225_v31 }
  0xd9   : > { %v321_v29 = vpop.f32.mrf.mxu0 }
  0xda   : > { %v322_v46 = vadd.f32 %v321_v29, %v224_v39  ;;  %v369_v48 = vadd.f32 %v365_v37, %v327_v41 }
  0xdb   : > { %v718_v33 = vpop.f32.mrf.mxu0 }
  0xdc   : > { %v337_v36 = vadd.f32 %v718_v33, %v227_v30  ;;  %v368_v49 = vadd.f32 %v364_v45, %v322_v46 }
  0xdd   : > { %v331_v40 = vpop.f32.mrf.mxu0 }
  0xde   : > { %v332_v43 = vadd.f32 %v331_v40, %v226_v34  ;;  %v371_v44 = vadd.f32 %v367_v35, %v337_v36 }
  0xe0   : > { %v370_v47 = vadd.f32 %v366_v42, %v332_v43  ;;  %719 = vmatprep.subr.mxu1 %v371_v44 }
  0xe1   : > { %720 = vmatpush3.msra.mxu1 %v371_v44 }
  0xe2   : > { %721 = vmatprep.subr.mxu1 %v370_v47 }
  0xe3   : > { %722 = vmatpush3.msra.mxu1 %v370_v47 }
  0xe4   : > { %723 = vmatprep.subr.mxu1 %v369_v48 }
  0xe5   : > { %724 = vmatpush3.msra.mxu1 %v369_v48 }
  0xe6   : > { %725 = vmatprep.subr.mxu1 %v368_v49 }
  0xe7   : > { %726 = vmatpush3.msra.mxu1 %v368_v49 }
  0xe8   : > { %728 = vmatmul.mubr.msk.f32.vlgmr.msra.gmra.mxu1 %vm242_vm0, %v233_v50 }
  0xe9   : > { %730 = vmatprep.mubr.msk.f32.mxu1 %vm242_vm0, %v234_v51 }
  0xec   : > { %731 = vmatmul.mubr.msk.f32.gmra.mxu1 %vm242_vm0, %v235_v52 }
 0x1a8   : > { %v729_v58 = vpop.f32.mrf.mxu1 }
 0x1a9   : > { %v472_v1 = vadd.f32 %v729_v58, %v378_v60 }
 0x1aa   : > { %v466_v59 = vpop.f32.mrf.mxu1 }
 0x1ab   : > { %v467_v4 = vadd.f32 %v466_v59, %v374_v63  ;;  %v486_v6 = vmax.f32 %v472_v1, 0.0 }
 0x1ac   : > { %v732_v61 = vpop.f32.mrf.mxu1 }
 0x1ad   : > { %v482_v62 = vadd.f32 %v732_v61, %v386_v57  ;;  %v485_v7 = vmax.f32 %v467_v4, 0.0 }
 0x1ae   : > { %v476_v0 = vpop.f32.mrf.mxu1 }
 0x1af   : > { %v488_v2 = vmax.f32 %v482_v62, 0.0  ;;  %v477_v3 = vadd.f32 %v476_v0, %v382_v56 }
 0x1b1   : > { %v487_v5 = vmax.f32 %v477_v3, 0.0  ;;  %734 = vmatpush3.msra.mxu0 %v488_v2 }
 0x1b2   : > { %735 = vmatprep.subr.mxu0 %v779_v53 }
 0x1b3   : > { %736 = vmatpush3.msra.mxu0 %v487_v5 }
 0x1b4   : > { %737 = vmatprep.subr.mxu0 %v779_v53 }
 0x1b5   : > { %738 = vmatpush3.msra.mxu0 %v486_v6 }
 0x1b6   : > { %739 = vmatprep.subr.mxu0 %v779_v53 }
 0x1b7   : > { %740 = vmatpush3.msra.mxu0 %v485_v7 }
 0x1b8   : > { %742 = vmatmul.mubr.msk.f32.vlgmr.msra.gmra.mxu0 %vm242_vm0, %v236_v8 }
 0x278   : > { %v563_v12 = vpop.f32.mrf.mxu0 }
 0x279   : > { %v564_v13 = vadd.f32 %v563_v12, %v492_v10 }
 0x27a   : > { %v743_v14 = vpop.f32.mrf.mxu0 }
 0x27b   : > { %v567_v15 = vmul.f32 %v564_v13, %v564_v13  ;;  %v591_v16 = vsel %vm590_vm3, %v564_v13, 0.0 }
 0x27d   : > { %v568_v17 = vadd.f32 1e-08, %v567_v15 }
 0x27f   : > { %767 = vrsqrt.f32 %v568_v17 }
 0x28c   : > { %v768_v20 = vpop.eup %767 }
 0x28d   : > { %v570_v21 = vmul.f32 %v768_v20, %v564_v13 }
 0x28f   : > { %v575_v22 = vmul.f32 %v574_v19, %v570_v21 }
 0x291   : > { %v576_v23 = vsub.f32 1.0, %v575_v22 }
 0x293   : > { %v577_v24 = vmul.f32 %v576_v23, %v576_v23 }
 0x295   : > { %v579_v25 = vsel %vm578_vm2, %v577_v24, 0.0 }
 0x296   : > { %580 = vadd.xlane.f32.xlu0 %v579_v25 }
 0x31f   : > { %v581_v26 = vpop.xlane.xlu0 %580 }
 0x320   : > { %v582_v27 = vrot.slane %v581_v26, 4 }
 0x322   : > { %v583_v28 = vadd.f32 %v582_v27, %v581_v26 }
 0x324   : > { %v584_v29 = vrot.slane %v583_v28, 2 }
 0x326   : > { %v585_v30 = vadd.f32 %v584_v29, %v583_v28 }
 0x328   : > { %v586_v31 = vrot.slane %v585_v30, 1 }
 0x32a   : > { %v587_v32 = vadd.f32 %v586_v31, %v585_v30 }
 0x32c   : > { %744 = vpush %v587_v32 }
 0x35d   : > { %s745_s29 = spop %744 }
 0x35e   : > { %s589_s30 = smul.f32 0.015625, %s745_s29 }
 0x360   : > { %v592_v33 = vstv %s589_s30 }
 0x361   : > { %v594_v34 = vsel %vm593_vm4, %v591_v16, %v592_v33 }
 0x362   : > { %v596_v35 = vsel %vm595_vm5, %v594_v34, 0.0 }
 0x363   : > { %597 = vst [vmem:[%s212_s7] sm:$0xff] %v596_v35 }
 0x364 PF: > { %s14_s15 = sadd.s32 1, %s775_s15  }
 0x365   : > { %p11_p4 = scmp.ge.s32.totalorder %s14_s15, 6  }
 0x367   :  { %13 = sbr.rel (!%p11_p4) target bundleno = 1 (0x1), region = 69 }

</bundles_post_ra>
